<compile_context>
chip_gen: v6e
topology: v6e:2x2x1
jax: 0.10.0
libtpu: 0.0.40
codegen_flags: <defaults>
</compile_context>

<pallas_src>
import jax
import jax.numpy as jnp
from jax.experimental import pallas as pl
from jax.experimental.pallas import tpu as pltpu

_GROUP = 8          # samples packed per row: (B,10)->(B/8,80) is a free
                    # row-major reshape; limits lane padding to 80->128 (1.6x)
                    # and block-diag flop overhead to 8x of a negligible matmul.
_SMALL_BATCH = 2048  # below this, plain XLA beats any kernel launch.


def _round_up(n, m):
    return ((n + m - 1) // m) * m


def _fc_packed_kernel(xp_ref, bw_ref, bb_ref, op_ref):
    # xp_ref : (TILE_R, G*Din)  current batch tile, 8 samples packed per row
    # bw_ref : (G*Din, G*Dout)  kron(I_8, W.T), resident across the whole grid
    # bb_ref : (1, G*Dout)      tile(b, 8), resident
    # op_ref : (TILE_R, G*Dout)
    acc = jnp.dot(xp_ref[...], bw_ref[...], preferred_element_type=jnp.float32)
    op_ref[...] = (acc + bb_ref[...]).astype(op_ref.dtype)


def minimal_policy_forward(x, w, b, *, max_tile_rows=8192, force_pallas=False):
    """x: (B, Din) f32, w: (Dout, Din) f32 (PyTorch layout), b: (Dout,) f32.

    Returns (B, Dout) f32 == x @ w.T + b.
    """
    B, Din = x.shape
    Dout = w.shape[0]

    # Small-batch bypass: at tiny B the pallas_call + packing cost more than
    # the whole op in XLA (review item 6).
    if B < _SMALL_BATCH and not force_pallas:
        return x @ w.T + b

    G = _GROUP
    # Pad batch only up to the packing group (8 samples), never to a full tile.
    # (Tiny forced batches are padded to one full 8-row sublane group.)
    b_pad = max(_round_up(B, G), G * 8)
    if b_pad != B:
        x = jnp.pad(x, ((0, b_pad - B), (0, 0)))
    rows = b_pad // G
    xp = x.reshape(rows, G * Din)            # free contiguous reshape, no HBM pass

    # Block-diagonal weight (G copies of W.T) and tiled bias; tiny, resident.
    big_wt = jnp.kron(jnp.eye(G, dtype=w.dtype), w.T)      # (G*Din, G*Dout)
    big_b = jnp.tile(b, G).reshape(1, G * Dout)             # (1, G*Dout)

    # Tile selection: as big as VMEM comfortably allows, but >= 2 tiles whenever
    # the batch allows it so the "parallel" grid feeds both v7x TensorCores.
    tile = min(max_tile_rows, max(8, _round_up(pl.cdiv(rows, 2), 8)))
    n_tiles = pl.cdiv(rows, tile)            # ragged last block is masked by Pallas

    cost = pl.CostEstimate(
        flops=2 * rows * (G * Din) * (G * Dout),
        transcendentals=0,
        bytes_accessed=4 * (rows * G * Din            # x read
                            + (G * Din) * (G * Dout)  # weights
                            + G * Dout                # bias
                            + rows * G * Dout),       # output write
    )

    out_p = pl.pallas_call(
        _fc_packed_kernel,
        out_shape=jax.ShapeDtypeStruct((rows, G * Dout), x.dtype),
        grid=(n_tiles,),
        in_specs=[
            pl.BlockSpec((tile, G * Din), lambda i: (i, 0)),        # x tile
            pl.BlockSpec((G * Din, G * Dout), lambda i: (0, 0)),    # W resident
            pl.BlockSpec((1, G * Dout), lambda i: (0, 0)),          # bias resident
        ],
        out_specs=pl.BlockSpec((tile, G * Dout), lambda i: (i, 0)),
        compiler_params=pltpu.CompilerParams(
            dimension_semantics=("parallel",),
            vmem_limit_bytes=30 * 1024 * 1024,   # big tiles fit on v5e too
        ),
        cost_estimate=cost,
    )(xp, big_wt, big_b)

    # Unpack (rows, G*Dout) -> (b_pad, Dout) (free reshape) and drop padding.
    return out_p.reshape(b_pad, Dout)[:B]


def init_params(key, in_features=10, out_features=10):
    # Deterministic init mimicking PyTorch nn.Linear default:
    # U(-1/sqrt(in), 1/sqrt(in)) for both weight and bias.
    kw, kb = jax.random.split(key)
    bound = 1.0 / jnp.sqrt(jnp.float32(in_features))
    w = jax.random.uniform(kw, (out_features, in_features), jnp.float32, -bound, bound)
    b = jax.random.uniform(kb, (out_features,), jnp.float32, -bound, bound)
    return w, b


if __name__ == "__main__":
    key = jax.random.PRNGKey(0)
    kx, kp = jax.random.split(key)

    B, Din, Dout = 2, 10, 10
    x = jax.random.normal(kx, (B, Din), jnp.float32)
    w, b = init_params(kp, Din, Dout)        # w: (out, in), PyTorch layout
    ref = x @ w.T + b

    # 1) Module-native tiny batch (B=2): default path takes the XLA bypass.
    out_small = jax.block_until_ready(minimal_policy_forward(x, w, b))
    assert out_small.shape == (B, Dout)
    assert jnp.allclose(out_small, ref, atol=1e-5), "mismatch vs reference (bypass)"

    # 2) Same tiny shape forced through the Pallas kernel (grid=(1,) path).
    out_small_pl = jax.block_until_ready(
        minimal_policy_forward(x, w, b, force_pallas=True))
    assert out_small_pl.shape == (B, Dout)
    assert jnp.allclose(out_small_pl, ref, atol=1e-5), "mismatch vs reference (pallas tiny)"

    # 3) Large batch: exercises the pipelined multi-tile path, the pad-to-8
    #    packing (B % 8 != 0) and the ragged last block (rows % tile != 0).
    B_big = 50003
    x_big = jax.random.normal(jax.random.PRNGKey(1), (B_big, Din), jnp.float32)
    out_big = jax.block_until_ready(minimal_policy_forward(x_big, w, b))
    ref_big = x_big @ w.T + b
    assert out_big.shape == (B_big, Dout)
    assert jnp.allclose(out_big, ref_big, atol=1e-4), "mismatch vs reference (large B)"

    print("KERNEL_OK")
</pallas_src>

<mosaic_0001>
module attributes {stable_mosaic.version = 11 : i64} {
  func.func @_fc_packed_kernel(%arg0: i32, %arg1: memref<8x80xf32, #tpu.memory_space<vmem>>, %arg2: memref<80x80xf32, #tpu.memory_space<vmem>>, %arg3: memref<1x80xf32, #tpu.memory_space<vmem>>, %arg4: memref<8x80xf32, #tpu.memory_space<vmem>>) attributes {dimension_semantics = [#tpu.dimension_semantics<parallel>], iteration_bounds = array<i64: 1>, scalar_prefetch = 0 : i64, scratch_operands = 0 : i64, tpu.core_type = #tpu.core_type<tc>, window_params = [{transform_indices = @transform_0, window_bounds = array<i64: 8, 80>}, {pipeline_mode = #tpu.pipeline_mode<synchronous>, transform_indices = @transform_1, window_bounds = array<i64: 80, 80>}, {pipeline_mode = #tpu.pipeline_mode<synchronous>, transform_indices = @transform_2, window_bounds = array<i64: 1, 80>}, {transform_indices = @transform_3, window_bounds = array<i64: 8, 80>}]} {
    %c0 = arith.constant 0 : index
    %c0_0 = arith.constant 0 : index
    %0 = vector.load %arg1[%c0, %c0_0] : memref<8x80xf32, #tpu.memory_space<vmem>>, vector<8x80xf32>
    %c0_1 = arith.constant 0 : index
    %c0_2 = arith.constant 0 : index
    %1 = vector.load %arg2[%c0_1, %c0_2] : memref<80x80xf32, #tpu.memory_space<vmem>>, vector<80x80xf32>
    %cst = arith.constant dense<0.000000e+00> : vector<8x80xf32>
    %2 = tpu.matmul %0, %1, %cst {dimension_numbers = #tpu.dot_dimension_numbers<[1], [0], [0], [1], [0, 0, 1, 1], [], []>} : vector<8x80xf32>, vector<80x80xf32>, vector<8x80xf32> -> vector<8x80xf32>
    %c0_3 = arith.constant 0 : index
    %c0_4 = arith.constant 0 : index
    %3 = vector.load %arg3[%c0_3, %c0_4] : memref<1x80xf32, #tpu.memory_space<vmem>>, vector<1x80xf32>
    %4 = vector.broadcast %3 : vector<1x80xf32> to vector<8x80xf32>
    %5 = arith.addf %2, %4 : vector<8x80xf32>
    %c0_5 = arith.constant 0 : index
    %c0_6 = arith.constant 0 : index
    %6 = vector.load %arg4[%c0_5, %c0_6] : memref<8x80xf32, #tpu.memory_space<vmem>>, vector<8x80xf32>
    tpu.vector_store %arg4[%c0_5, %c0_6], %5 {strides = array<i32>} : memref<8x80xf32, #tpu.memory_space<vmem>>, vector<8x80xf32>,
    return
  }
  func.func @transform_0(%arg0: i32) -> (i32, i32) {
    %c0_i32 = arith.constant 0 : i32
    %c0_i32_0 = arith.constant 0 : i32
    return %arg0, %c0_i32 : i32, i32
  }
  func.func @transform_1(%arg0: i32) -> (i32, i32) {
    %c0_i32 = arith.constant 0 : i32
    %c0_i32_0 = arith.constant 0 : i32
    %c0_i32_1 = arith.constant 0 : i32
    return %c0_i32, %c0_i32_0 : i32, i32
  }
  func.func @transform_2(%arg0: i32) -> (i32, i32) {
    %c0_i32 = arith.constant 0 : i32
    %c0_i32_0 = arith.constant 0 : i32
    %c0_i32_1 = arith.constant 0 : i32
    return %c0_i32, %c0_i32_0 : i32, i32
  }
  func.func @transform_3(%arg0: i32) -> (i32, i32) {
    %c0_i32 = arith.constant 0 : i32
    %c0_i32_0 = arith.constant 0 : i32
    return %arg0, %c0_i32 : i32, i32
  }
}

</mosaic_0001>

<bundles_post_ra>
// kernel: tpu_custom_call.1
= control target key start
LH: loop header
LB: loop body
LE: loop exit
PB: predicated region body
PF: predicated region fallthrough
CT: control target
= control target key end

     0   :  { %8 = vsyncpa [#allocation3], 0  ;;  %s298_s0 = inlined_call_operand.hbm [shape: f32[8,80], index: 0, kind: input, shape index: {}]   ;;  %s299_s1 = inlined_call_operand.hbm [shape: f32[80,80], index: 1, kind: input, shape index: {}]   ;;  %s300_s2 = inlined_call_operand.vmem [shape: f32[1,80], index: 2, kind: input, shape index: {}]   ;;  %s301_s3 = inlined_call_operand.hbm [shape: f32[8,80], index: 3, kind: output, shape index: {}]  }
   0x1   :  { %9 = vsyncpa [#allocation6], 0 }
   0x2   :  { %10 = vsyncpa [#allocation4], 0  ;;  %s259_s12 = smov [#allocation2]   ;;  %s260_s14 = smov [#allocation5]  }
   0x3   :  { %s17_s13 = sshll.u32 %s259_s12, 4  ;;  %s26_s15 = sshll.u32 %s260_s14, 4  ;;  %s18_s13 = int_to_ptr.vmem [resolvable:$true] %s17_s13  ;;  %s27_s15 = int_to_ptr.vmem [resolvable:$true] %s26_s15 }
   0x4   :  { %s201_s16 = scalar_lea.vmem %s18_s13, 128  ;;  %p206_p1 = scmp.lt.s32.totalorder %s18_s13, %s18_s13 }
   0x5   :  { %p202_p0 = scmp.ne.s32.totalorder %s18_s13, %s201_s16  ;;  %p207_p2 = scmp.lt.s32.totalorder %s201_s16, %s201_s16 }
   0x7   :  { %p208_p3 = por %p207_p2, %p206_p1 }
   0x9   :  { %p209_p4 = pnand %p208_p3, %p202_p0 }
   0xb   :  { %212 = shalt.err (!%p209_p4)
}
   0xc   :  { %20 = dma.hbm_to_vmem [thread:$0]  %s298_s0, 128, %s18_s13, [#allocation3]  }
   0xd   :  { %s221_s19 = scalar_lea.vmem %s27_s15, 1280  ;;  %p226_p6 = scmp.lt.s32.totalorder %s27_s15, %s27_s15 }
   0xe   :  { %p222_p5 = scmp.ne.s32.totalorder %s27_s15, %s221_s19  ;;  %p227_p7 = scmp.lt.s32.totalorder %s221_s19, %s221_s19 }
  0x10   :  { %p228_p8 = por %p227_p7, %p226_p6 }
  0x12   :  { %p229_p9 = pnand %p228_p8, %p222_p5 }
  0x14   :  { %232 = shalt.err (!%p229_p9)
}
  0x15   :  { %s261_s20 = smov 128   ;;  %s262_s21 = smov 8  }
  0x16   :  { %32 = dma.hbm_to_vmem [thread:$0]  %s299_s1, 1280, %s27_s15, [#allocation6], %s261_s20, %s261_s20, %s262_s21  }
  0x17   :  { %253 = dma.done.wait [#allocation3], 128  }
  0x18   :  { %254 = vsyncadd [#allocation3], 4294967168 }
  0x19   :  { %255 = dma.done.wait [#allocation6], 1280  }
  0x1a   :  { %256 = vsyncadd [#allocation6], 4294966016  ;;  %v263_v0 = vmov 0.0   ;;  %vm264_vm0 = vmmov 0   ;;  %v51_v1 = vld [vmem:[#allocation5 + $0x48] sm:$0xff]  ;;  %v50_v2 = vld [vmem:[#allocation5 + $0x40] sm:$0xff] }
  0x1b   :  { %163 = vmatprep.subr.mxu0 %v263_v0  ;;  %183 = vmatprep.mubr.msk.f32.mxu0 %vm264_vm0, %v263_v0  ;;  %v49_v3 = vld [vmem:[#allocation5 + $0x38] sm:$0xff]  ;;  %v48_v4 = vld [vmem:[#allocation5 + $0x30] sm:$0xff]  ;;  %v47_v5 = vld [vmem:[#allocation5 + $0x28] sm:$0xff]  ;;  %vm59_vm1 = vcmask 654336   ;;  %s265_s24 = smov [#allocation7]  }
  0x1c   :  { %164 = vmatpush3.msra.mxu0 %v51_v1  ;;  %v46_v6 = vld [vmem:[#allocation5 + $0x20] sm:$0xff]  ;;  %v45_v7 = vld [vmem:[#allocation5 + $0x18] sm:$0xff]  ;;  %v44_v8 = vld [vmem:[#allocation5 + $0x10] sm:$0xff]  ;;  %s140_s25 = sshll.u32 %s265_s24, 4  ;;  %s141_s25 = int_to_ptr.vmem [resolvable:$true] %s140_s25 }
  0x1d   :  { %165 = vmatprep.subr.mxu0 %v263_v0  ;;  %v43_v9 = vld [vmem:[#allocation5 + $0x8] sm:$0xff]  ;;  %v42_v10 = vld [vmem:[#allocation5] sm:$0xff]  ;;  %v41_v11 = vld [vmem:[#allocation2] sm:$0xff]  ;;  %s233_s26 = scalar_lea.vmem %s141_s25, 128  ;;  %p238_p11 = scmp.lt.s32.totalorder %s141_s25, %s141_s25 }
  0x1e   :  { %166 = vmatpush3.msra.mxu0 %v50_v2  ;;  %v150_v12 = vld [vmem:[%s300_s2] ss:$0 sm:$0xff]  ;;  %p234_p10 = scmp.ne.s32.totalorder %s141_s25, %s233_s26  ;;  %p239_p12 = scmp.lt.s32.totalorder %s233_s26, %s233_s26 }
  0x1f   :  { %167 = vmatprep.subr.mxu0 %v263_v0 }
  0x20   :  { %168 = vmatpush3.msra.mxu0 %v49_v3  ;;  %p240_p13 = por %p239_p12, %p238_p11 }
  0x21   :  { %169 = vmatprep.subr.mxu0 %v263_v0 }
  0x22   :  { %170 = vmatpush3.msra.mxu0 %v48_v4  ;;  %p241_p0 = pnand %p240_p13, %p234_p10 }
  0x23   :  { %171 = vmatprep.subr.mxu0 %v263_v0 }
  0x24   :  { %172 = vmatpush3.msra.mxu0 %v47_v5 }
  0x25   :  { %173 = vmatprep.subr.mxu0 %v263_v0 }
  0x26   :  { %174 = vmatpush3.msra.mxu0 %v46_v6 }
  0x27   :  { %175 = vmatprep.subr.mxu0 %v263_v0 }
  0x28   :  { %176 = vmatpush3.msra.mxu0 %v45_v7 }
  0x29   :  { %177 = vmatprep.subr.mxu0 %v263_v0 }
  0x2a   :  { %178 = vmatpush3.msra.mxu0 %v44_v8 }
  0x2b   :  { %179 = vmatprep.subr.mxu0 %v263_v0 }
  0x2c   :  { %180 = vmatpush3.msra.mxu0 %v43_v9 }
  0x2d   :  { %181 = vmatprep.subr.mxu0 %v263_v0 }
  0x2e   :  { %182 = vmatpush3.msra.mxu0 %v42_v10 }
  0x2f   :  { %184 = vmatmul.mubr.msk.f32.vlgmr.msra.gmra.mxu0 %vm59_vm1, %v41_v11 }
  0xef   :  { %v129_v13 = vpop.f32.mrf.mxu0 }
  0xf0   :  { %v130_v14 = vadd.f32 %v150_v12, %v129_v13 }
  0xf1   :  { %v185_v15 = vpop.f32.mrf.mxu0 }
  0xf2   :  { %133 = vst.msk [vmem:[#allocation7] sm:$0xff] %vm59_vm1, %v130_v14 }
  0xf3   :  { %244 = shalt.err (!%p241_p0)
}
  0xf4   :  { %143 = dma.vmem_to_hbm [thread:$0]  %s141_s25, 128, %s301_s3, [#allocation4]  }
  0xf5   :  { %257 = dma.done.wait [#allocation4], 128  }
  0xf6   :  { %258 = vsyncadd [#allocation4], 4294967168 }
  0xf7   :  { %147 = vsyncpa [#allocation3], 1 }
  0xf8   :  { %148 = vsyncpa [#allocation6], 1 }
  0xf9   :  { %149 = vsyncpa [#allocation4], 1 }

</bundles_post_ra>
